<compile_context>
chip_gen: v7x
topology: tpu7x:2x2x1
jax: 0.10.0
libtpu: 0.0.40
codegen_flags: <defaults>
</compile_context>

<pallas_src>
import functools
import math

import numpy as np
import jax
import jax.numpy as jnp
from jax.experimental import pallas as pl
from jax.experimental.pallas import tpu as pltpu

# Small synthetic shapes consistent with the module (idim=H, odim=2, 5 layers, k=5).
B, T, IDIM, NCH, NLAYERS, ODIM, K = 2, 16, 32, 64, 5, 2, 5
BT = B * T                 # batch folded into the GEMM M dimension
PAD = (K - 1) // 2
EPS = 1e-5                 # torch.nn.LayerNorm default eps
LANE = 128                 # vreg lane width: each conv tap owns one aligned lane block


def _pick_mxu_dtype():
    """bf16 MXU operands on bf16-native MXUs (v6e/v7x); f32 elsewhere.

    Accumulation stays f32 via preferred_element_type; all elementwise /
    LayerNorm math stays f32 on every generation (v5e has no bf16 VPU/EUP).
    """
    try:
        kind = jax.devices()[0].device_kind.lower()
    except Exception:
        return jnp.float32
    if ("v6" in kind) or ("v7" in kind) or ("7x" in kind):
        return jnp.bfloat16
    return jnp.float32


MXU_DTYPE = _pick_mxu_dtype()


@functools.lru_cache(maxsize=None)
def _roll_is_numpy_convention() -> bool:
    """One-off probe pinning pltpu.roll's rotation direction.

    Returns True iff pltpu.roll matches jnp.roll, i.e. out[i] = x[(i - shift) % n].
    The conv tap alignment below is derived from this flag, so it is correct
    under either hardware/rotate convention.
    """
    def probe(x_ref, o_ref):
        o_ref[...] = pltpu.roll(x_ref[...], 1, axis=0)

    x = jnp.broadcast_to(jnp.arange(8, dtype=jnp.float32)[:, None], (8, 128))
    out = pl.pallas_call(
        probe, out_shape=jax.ShapeDtypeStruct((8, 128), jnp.float32))(x)
    return bool(out[1, 0] == x[0, 0])


def _make_vp_kernel(np_roll: bool):
    def vp_kernel(x_ref, pos_ref, alpha_ref, m_ref, w0_ref, b0_ref, wr_ref,
                  br_ref, g_ref, bt_ref, lw_ref, lb_ref, o_ref):
        """Fused pos-add + 5x(Conv1d + ReLU + LayerNorm) + Linear on one [BT, C] slab."""
        inv_n = jnp.float32(1.0 / NCH)
        # Lane-dense per-tap boundary masks ([BT, NCH] each), loaded ONCE and
        # reused by every conv layer — no re-emitted broadcasts in the layer loop.
        tap_mask = [m_ref[k] if k != PAD else None for k in range(K)]

        def shift_rows(y, s):
            # result[t] = y[(t + s) mod BT]; wrap-around / cross-sequence rows
            # are zeroed by tap_mask at the call site.
            amt = (-s) % BT if np_roll else s % BT
            return pltpu.roll(y, amt, axis=0)

        def conv_relu_ln(h, w_wide, bias, gamma, beta):
            # One GEMM per layer (kn2row).  w_wide is [Cin, K*LANE]: tap k's
            # weights occupy lanes [k*LANE, k*LANE + NCH) of their own 128-lane
            # block, so every tap extraction below is a vreg-aligned static
            # view (no XLU lane rotates), only sublane rolls remain.
            y = jnp.dot(h.astype(MXU_DTYPE), w_wide,
                        preferred_element_type=jnp.float32)       # [BT, K*LANE]
            acc = y[:, PAD * LANE:PAD * LANE + NCH]               # center tap, s = 0
            for k in range(K):
                s = k - PAD
                if s == 0:
                    continue
                blk = shift_rows(y[:, k * LANE:k * LANE + NCH], s)
                acc = acc + blk * tap_mask[k]
            a = jnp.maximum(acc + bias, 0.0)                      # conv bias + ReLU
            # LayerNorm over channels, centered two-pass variance (bf16-robust).
            mean = jnp.sum(a, axis=-1, keepdims=True) * inv_n
            d = a - mean
            var = jnp.sum(d * d, axis=-1, keepdims=True) * inv_n
            # Dropout(0.1) is identity in eval mode.
            return d * jax.lax.rsqrt(var + EPS) * gamma + beta

        # Positional-embedding scale-and-add fused into the kernel (alpha in SMEM).
        x = x_ref[...] + alpha_ref[0] * pos_ref[...]

        h = conv_relu_ln(x, w0_ref[...], b0_ref[...], g_ref[0], bt_ref[0])
        for l in range(NLAYERS - 1):
            h = conv_relu_ln(h, wr_ref[l], br_ref[l], g_ref[l + 1], bt_ref[l + 1])

        # Final Linear(n_chans -> odim): ODIM equals the full output minor dim,
        # so the narrow block is legal; a few masked-store cycles beat a padded
        # 128-lane writeback plus a wrapper slice at this size.
        o_ref[...] = (jnp.dot(h.astype(MXU_DTYPE), lw_ref[...],
                              preferred_element_type=jnp.float32)
                      + lb_ref[...]).astype(o_ref.dtype)

    return vp_kernel


def _widen_conv_weight(w):
    # (K, Cin, Cout) -> (Cin, K*LANE): tap k's [Cin, Cout] block lives in lanes
    # [k*LANE, k*LANE + Cout); the rest is zero.  128-lane-aligned tap blocks
    # make the in-kernel GEMM-output slices free static views.
    k, cin, cout = w.shape
    wide = jnp.zeros((cin, k * LANE), jnp.float32)
    for kk in range(k):
        wide = wide.at[:, kk * LANE:kk * LANE + cout].set(w[kk])
    return wide


def _tap_boundary_mask():
    # [K, BT, NCH] f32, lane-dense: mask[k, t, :] = 1 iff (t % T) + (k - PAD)
    # stays inside its own sequence.  Implements SAME zero padding for the
    # rolled taps and blocks leakage across the folded batch boundary.
    # Pre-broadcast over channels so the kernel never re-emits broadcast_in_dim
    # inside the unrolled layer/tap loops.
    tt = np.arange(BT) % T
    m = np.stack([((tt + (k - PAD) >= 0) & (tt + (k - PAD) < T))
                  for k in range(K)], axis=0).astype(np.float32)
    return jnp.asarray(np.ascontiguousarray(
        np.broadcast_to(m[:, :, None], (K, BT, NCH))))


def build_sin_table(init_size, dim, padding_idx=0):
    # fairseq SinusoidalPositionalEmbedding.get_embedding
    half = dim // 2
    emb = math.log(10000.0) / (half - 1)
    inv = np.exp(np.arange(half, dtype=np.float64) * -emb)
    pos = np.arange(init_size, dtype=np.float64)[:, None] * inv[None, :]
    table = np.concatenate([np.sin(pos), np.cos(pos)], axis=1)
    if dim % 2 == 1:
        table = np.concatenate([table, np.zeros((init_size, 1))], axis=1)
    table[padding_idx, :] = 0.0
    return jnp.asarray(table, dtype=jnp.float32)


def sinusoidal_positions(xs, table):
    # embed_positions(xs[..., 0]): make_positions (cumsum of non-pad mask) + gather.
    tok = xs[..., 0]                                  # [B, T]
    mask = (tok != 0.0).astype(jnp.int32)
    pos_idx = jnp.cumsum(mask, axis=1) * mask         # padding_idx = 0
    return table[pos_idx]                             # [B, T, IDIM]


def variance_predictor_pallas(xs, p):
    # Glue (tiny, data-dependent gather): sinusoidal positional embedding lookup.
    pos = sinusoidal_positions(xs, p["pos_table"])
    x_flat = xs.astype(jnp.float32).reshape(BT, IDIM)
    pos_flat = pos.astype(jnp.float32).reshape(BT, IDIM)

    # Parameter repacking in the wrapper (plain XLA, once per call).
    w0w = _widen_conv_weight(p["w0"]).astype(MXU_DTYPE)           # [IDIM, K*LANE]
    wr4 = p["wr"].reshape(NLAYERS - 1, K, NCH, NCH)
    wrw = jnp.stack([_widen_conv_weight(wr4[l])
                     for l in range(NLAYERS - 1)]).astype(MXU_DTYPE)  # [L-1, NCH, K*LANE]
    lw = p["lw"].astype(MXU_DTYPE)                                # [NCH, ODIM]
    tap_mask = _tap_boundary_mask()                               # [K, BT, NCH]

    kernel = _make_vp_kernel(_roll_is_numpy_convention())

    # Single fused step: the whole problem (<1 MiB weights + a few KiB of
    # activations) is resident in VMEM on every TPU generation.  For realistic
    # (long) T, tile BT with a (K-1)-row halo, keep the weight index_maps
    # constant (pinned), and mark the row axis "parallel" (uses both v7x TCs).
    out = pl.pallas_call(
        kernel,
        out_shape=jax.ShapeDtypeStruct((BT, ODIM), jnp.float32),
        grid=(1,),
        in_specs=[
            pl.BlockSpec((BT, IDIM), lambda i: (0, 0)),                    # xs
            pl.BlockSpec((BT, IDIM), lambda i: (0, 0)),                    # positions
            pl.BlockSpec(memory_space=pltpu.MemorySpace.SMEM),             # alpha scalar
            pl.BlockSpec((K, BT, NCH), lambda i: (0, 0, 0)),               # tap masks
            pl.BlockSpec((IDIM, K * LANE), lambda i: (0, 0)),              # conv0 W (kn2row)
            pl.BlockSpec((1, NCH), lambda i: (0, 0)),                      # conv0 b
            pl.BlockSpec((NLAYERS - 1, NCH, K * LANE), lambda i: (0, 0, 0)),  # conv1..4 W
            pl.BlockSpec((NLAYERS - 1, 1, NCH), lambda i: (0, 0, 0)),      # conv1..4 b
            pl.BlockSpec((NLAYERS, 1, NCH), lambda i: (0, 0, 0)),          # LN gamma
            pl.BlockSpec((NLAYERS, 1, NCH), lambda i: (0, 0, 0)),          # LN beta
            pl.BlockSpec((NCH, ODIM), lambda i: (0, 0)),                   # linear W
            pl.BlockSpec((1, ODIM), lambda i: (0, 0)),                     # linear b
        ],
        out_specs=pl.BlockSpec((BT, ODIM), lambda i: (0, 0)),
        compiler_params=pltpu.CompilerParams(
            dimension_semantics=("arbitrary",)),
    )(x_flat, pos_flat, p["alpha"], tap_mask, w0w, p["b0"], wrw, p["br"],
      p["ln_g"], p["ln_b"], lw, p["lb"])

    return out.reshape(B, T, ODIM)


def variance_predictor_ref(xs, p):
    # Pure-JAX reference mirroring the PyTorch forward (eval mode).
    pos = sinusoidal_positions(xs, p["pos_table"])
    h = xs + p["alpha"] * pos
    for l in range(NLAYERS):
        w = p["w0"] if l == 0 else p["wr"][(l - 1) * K: l * K]
        b = p["b0"][0] if l == 0 else p["br"][l - 1, 0]
        hp = jnp.pad(h, ((0, 0), (PAD, PAD), (0, 0)))
        acc = sum(jnp.einsum("btc,cd->btd", hp[:, k:k + T], w[k]) for k in range(K)) + b
        h = jax.nn.relu(acc)
        mean = h.mean(-1, keepdims=True)
        var = ((h - mean) ** 2).mean(-1, keepdims=True)
        h = (h - mean) / jnp.sqrt(var + EPS) * p["ln_g"][l, 0] + p["ln_b"][l, 0]
    return jnp.einsum("btc,cd->btd", h, p["lw"]) + p["lb"][0]


def make_params(key):
    ks = jax.random.split(key, 8)
    return {
        # conv weights stored as (k, Cin, Cout) == torch conv.weight.transpose
        "w0": jax.random.normal(ks[0], (K, IDIM, NCH), jnp.float32) * 0.05,
        "b0": jax.random.normal(ks[1], (1, NCH), jnp.float32) * 0.01,
        "wr": jax.random.normal(ks[2], ((NLAYERS - 1) * K, NCH, NCH), jnp.float32) * 0.05,
        "br": jax.random.normal(ks[3], (NLAYERS - 1, 1, NCH), jnp.float32) * 0.01,
        "ln_g": 1.0 + 0.01 * jax.random.normal(ks[4], (NLAYERS, 1, NCH), jnp.float32),
        "ln_b": 0.01 * jax.random.normal(ks[5], (NLAYERS, 1, NCH), jnp.float32),
        # linear stored as (Cin, odim) == torch linear.weight.T
        "lw": jax.random.normal(ks[6], (NCH, ODIM), jnp.float32) * 0.05,
        "lb": jnp.zeros((1, ODIM), jnp.float32),
        "alpha": jnp.ones((1,), jnp.float32),           # pos_embed_alpha
        "pos_table": build_sin_table(4096, IDIM, 0),    # SinusoidalPositionalEmbedding
    }


if __name__ == "__main__":
    key = jax.random.PRNGKey(0)
    pkey, xkey = jax.random.split(key)
    params = make_params(pkey)
    xs = jax.random.normal(xkey, (B, T, IDIM), jnp.float32)   # [B, T, H]

    out = variance_predictor_pallas(xs, params)
    out = jax.block_until_ready(out)

    ref = variance_predictor_ref(xs, params)
    # bf16 MXU operands (auto-selected on v6e/v7x) need a looser tolerance;
    # f32 operands (v5e / others) keep the tight one.
    tol = 3e-2 if MXU_DTYPE == jnp.bfloat16 else 1e-3
    np.testing.assert_allclose(np.asarray(out), np.asarray(ref), rtol=tol, atol=tol)
    assert out.shape == (B, T, ODIM)
    print("KERNEL_OK")
</pallas_src>

<mosaic_0001>
module attributes {stable_mosaic.version = 11 : i64} {
  func.func @probe(%arg0: memref<8x128xf32, #tpu.memory_space<vmem>>, %arg1: memref<8x128xf32, #tpu.memory_space<vmem>>) attributes {dimension_semantics = [], scalar_prefetch = 0 : i64, scratch_operands = 0 : i64, tpu.core_type = #tpu.core_type<tc>} {
    %c0 = arith.constant 0 : index
    %c0_0 = arith.constant 0 : index
    %0 = vector.load %arg0[%c0, %c0_0] : memref<8x128xf32, #tpu.memory_space<vmem>>, vector<8x128xf32>
    %c1_i32 = arith.constant 1 : i32
    %1 = tpu.dynamic_rotate %0 by %c1_i32 dim 0 : vector<8x128xf32>, i32 -> vector<8x128xf32>
    %c0_1 = arith.constant 0 : index
    %c0_2 = arith.constant 0 : index
    %2 = vector.load %arg1[%c0_1, %c0_2] : memref<8x128xf32, #tpu.memory_space<vmem>>, vector<8x128xf32>
    tpu.vector_store %arg1[%c0_1, %c0_2], %1 {strides = array<i32>} : memref<8x128xf32, #tpu.memory_space<vmem>>, vector<8x128xf32>,
    return
  }
}

</mosaic_0001>

<bundles_post_ra>
// kernel: tpu_custom_call.1
= control target key start
LH: loop header
LB: loop body
LE: loop exit
PB: predicated region body
PF: predicated region fallthrough
CT: control target
= control target key end

     0   :  { %6 = vsyncpa [#allocation3], 0  ;;  %s125_s0 = inlined_call_operand.hbm [shape: f32[8,128], index: 0, kind: input, shape index: {}]   ;;  %s126_s1 = inlined_call_operand.hbm [shape: f32[8,128], index: 1, kind: output, shape index: {}]  }
   0x1   :  { %7 = vsyncpa [#allocation4], 0  ;;  %s89_s6 = smov [#allocation2]   ;;  %s41_s10 = scalar_lea.hbm %s125_s0, 128 }
   0x2   :  { %s14_s7 = sshll.u32 %s89_s6, 4  ;;  %p42_p0 = scmp.ne.s32.totalorder %s125_s0, %s41_s10  ;;  %s15_s7 = int_to_ptr.vmem [resolvable:$true] %s14_s7 }
   0x3   :  { %p45_p1 = scmp.lt.u32.totalorder %s41_s10, %s125_s0 }
   0x5   :  { %p47_p2 = pnand %p45_p1, %p42_p0 }
   0x7   :  { %50 = shalt.err (!%p47_p2)
}
   0x8   :  { %s51_s15 = scalar_lea.vmem %s15_s7, 128  ;;  %p56_p4 = scmp.lt.s32.totalorder %s15_s7, %s15_s7 }
   0x9   :  { %p52_p3 = scmp.ne.s32.totalorder %s15_s7, %s51_s15  ;;  %p57_p5 = scmp.lt.s32.totalorder %s51_s15, %s51_s15 }
   0xb   :  { %p58_p6 = por %p57_p5, %p56_p4 }
   0xd   :  { %p59_p7 = pnand %p58_p6, %p52_p3 }
   0xf   :  { %62 = shalt.err (!%p59_p7)
}
  0x10   :  { %17 = dma.hbm_to_vmem [thread:$0]  %s125_s0, 128, %s15_s7, [#allocation3]  }
  0x11   :  { %85 = dma.done.wait [#allocation3], 128  }
  0x12   :  { %86 = vsyncadd [#allocation3], 4294967168  ;;  %s90_s18 = smov [#allocation5]   ;;  %v21_v0 = vld [vmem:[#allocation2] sm:$0xff] }
  0x13   :  { %s30_s19 = sshll.u32 %s90_s18, 4  ;;  %v22_v1 = vrot.slane %v21_v0, 7  ;;  %s31_s19 = int_to_ptr.vmem [resolvable:$true] %s30_s19 }
  0x14   :  { %s63_s20 = scalar_lea.vmem %s31_s19, 128  ;;  %p68_p9 = scmp.lt.s32.totalorder %s31_s19, %s31_s19 }
  0x15   :  { %23 = vst [vmem:[#allocation5] sm:$0xff] %v22_v1  ;;  %p64_p8 = scmp.ne.s32.totalorder %s31_s19, %s63_s20  ;;  %p69_p10 = scmp.lt.s32.totalorder %s63_s20, %s63_s20 }
  0x17   :  { %p70_p11 = por %p69_p10, %p68_p9 }
  0x19   :  { %p71_p12 = pnand %p70_p11, %p64_p8 }
  0x1b   :  { %74 = shalt.err (!%p71_p12)
}
  0x1c   :  { %s75_s23 = scalar_lea.hbm %s126_s1, 128 }
  0x1d   :  { %p76_p13 = scmp.ne.s32.totalorder %s126_s1, %s75_s23  ;;  %p79_p0 = scmp.lt.u32.totalorder %s75_s23, %s126_s1 }
  0x1f   :  { %p81_p1 = pnand %p79_p0, %p76_p13 }
  0x21   :  { %84 = shalt.err (!%p81_p1)
}
  0x22   :  { %33 = dma.vmem_to_hbm [thread:$0]  %s31_s19, 128, %s126_s1, [#allocation4]  }
  0x23   :  { %87 = dma.done.wait [#allocation4], 128  }
  0x24   :  { %88 = vsyncadd [#allocation4], 4294967168 }
  0x25   :  { %37 = vsyncpa [#allocation3], 1 }
  0x26   :  { %38 = vsyncpa [#allocation4], 1 }

</bundles_post_ra>
